<compile_context>
chip_gen: v7x
topology: tpu7x:2x2x1
jax: 0.10.0
libtpu: 0.0.40
codegen_flags: <defaults>
</compile_context>

<pallas_src>
import functools

import jax
import jax.numpy as jnp
from jax.experimental import pallas as pl
from jax.experimental.pallas import tpu as pltpu

# Contract the LAST dim of both operands (A @ B^T), i.e. 'oi,bi->ob'.
_NT_DIMS = (((1,), (1,)), ((), ()))


def _qnet_kernel(x_ref,
                 w1_ref, b1_ref,
                 w2_ref, b2_ref,
                 w3_ref, b3_ref,
                 w4_ref, b4_ref,
                 o_ref):
    # One batch tile of the whole MLP, fully fused.
    # Matmul operands stay in the weight dtype (f32 or bf16, MXU-native);
    # accumulation and all elementwise work (bias add, ReLU) stay in f32.
    wdt = w1_ref.dtype
    x = x_ref[...].astype(wdt)                                  # [Bt, state]

    # Layer 1: contract the feature axis of the untransposed batch tile.
    h = jax.lax.dot_general(w1_ref[...], x, dimension_numbers=_NT_DIMS,
                            preferred_element_type=jnp.float32)  # [mid, Bt]
    h = jnp.maximum(h + b1_ref[...], 0.0)

    h = jnp.dot(w2_ref[...], h.astype(wdt),
                preferred_element_type=jnp.float32) + b2_ref[...]
    h = jnp.maximum(h, 0.0)

    h = jnp.dot(w3_ref[...], h.astype(wdt),
                preferred_element_type=jnp.float32) + b3_ref[...]
    h = jnp.maximum(h, 0.0)

    out = jnp.dot(w4_ref[...], h.astype(wdt),
                  preferred_element_type=jnp.float32) + b4_ref[...]  # [act, Bt]
    o_ref[...] = out.astype(o_ref.dtype)


def _pick_block_b(batch):
    """Lane-axis batch tile: a multiple of 128, aiming for ~4 grid steps (so the
    DMA/compute pipeline has work and the tiles can shard across both v7x
    TensorCores) while staying large enough to amortize per-step overhead."""
    approx = pl.cdiv(batch, 4)
    bb = pl.cdiv(approx, 128) * 128
    return max(128, min(bb, 8192))


@functools.partial(jax.jit, static_argnames=("block_b",))
def qnet_forward(state, params, block_b=None):
    """state: [B, state_dim] (any float dtype). params: PyTorch-layout weights
    w_i [out, in] (f32 or bf16) and biases b_i [out, 1] (f32).
    Returns [B, action_dim] f32."""
    B, state_dim = state.shape
    w1, b1 = params["w1"], params["b1"]
    w2, b2 = params["w2"], params["b2"]
    w3, b3 = params["w3"], params["b3"]
    w4, b4 = params["w4"], params["b4"]
    mid_dim = w1.shape[0]
    action_dim = w4.shape[0]

    if block_b is None:
        block_b = _pick_block_b(B)

    # Pad the batch up to a multiple of the lane tile (sliced away afterwards).
    padded_b = pl.cdiv(B, block_b) * block_b
    if padded_b != B:
        state_in = jnp.pad(state, ((0, padded_b - B), (0, 0)))
    else:
        state_in = state
    grid = (padded_b // block_b,)

    # Full-tensor constant blocks: the block index never changes across the grid,
    # so Pallas keeps them VMEM-resident instead of re-fetching per step.
    def const(shape):
        return pl.BlockSpec(shape, lambda i: (0, 0))

    flops = 2 * padded_b * (state_dim * mid_dim + 2 * mid_dim * mid_dim
                            + mid_dim * action_dim)
    bytes_accessed = (state_in.size * state_in.dtype.itemsize
                      + sum(p.size * p.dtype.itemsize
                            for p in (w1, b1, w2, b2, w3, b3, w4, b4))
                      + padded_b * action_dim * 4)

    out_t = pl.pallas_call(
        _qnet_kernel,
        out_shape=jax.ShapeDtypeStruct((action_dim, padded_b), jnp.float32),
        grid_spec=pltpu.PrefetchScalarGridSpec(
            num_scalar_prefetch=0,
            grid=grid,
            in_specs=[
                pl.BlockSpec((block_b, state_dim), lambda i: (i, 0)),  # x tile
                const(w1.shape), const(b1.shape),
                const(w2.shape), const(b2.shape),
                const(w3.shape), const(b3.shape),
                const(w4.shape), const(b4.shape),
            ],
            out_specs=pl.BlockSpec((action_dim, block_b), lambda i: (0, i)),
        ),
        compiler_params=pltpu.CompilerParams(
            dimension_semantics=("parallel",),     # batch tiles shard across TCs
            vmem_limit_bytes=32 * 1024 * 1024,     # explicit; fits v7x (64 MiB VMEM)
        ),
        cost_estimate=pl.CostEstimate(
            flops=flops, transcendentals=0, bytes_accessed=bytes_accessed),
    )(state_in, w1, b1, w2, b2, w3, b3, w4, b4)

    # [action_dim, padded_b] -> [B, action_dim]; the transposed slab is tiny.
    return jnp.transpose(out_t[:, :B])


def init_qnet_params(key, state_dim, mid_dim, action_dim, dtype=jnp.float32):
    """nn.Linear-style U(-1/sqrt(fan_in), +1/sqrt(fan_in)) init.
    Weights kept in native PyTorch [out, in] layout; biases as [out, 1] f32."""
    dims = [(state_dim, mid_dim), (mid_dim, mid_dim),
            (mid_dim, mid_dim), (mid_dim, action_dim)]
    params = {}
    for idx, (fan_in, fan_out) in enumerate(dims, start=1):
        key, kw, kb = jax.random.split(key, 3)
        bound = 1.0 / jnp.sqrt(jnp.float32(fan_in))
        w = jax.random.uniform(kw, (fan_out, fan_in), jnp.float32,
                               minval=-bound, maxval=bound)
        b = jax.random.uniform(kb, (fan_out,), jnp.float32,
                               minval=-bound, maxval=bound)
        params[f"w{idx}"] = w.astype(dtype)                # [out, in]
        params[f"b{idx}"] = b.reshape(fan_out, 1)          # [out, 1], f32
    return params


def qnet_reference(state, params):
    """Pure-JAX reference mirroring the kernel's dtype strategy: matmul operands
    in the weight dtype, f32 accumulation, bias add + ReLU in f32."""
    wdt = params["w1"].dtype
    h = state.astype(wdt)
    for idx in range(1, 5):
        w, b = params[f"w{idx}"], params[f"b{idx}"]
        h = (jnp.dot(h, w.T, preferred_element_type=jnp.float32)
             + b.reshape(1, -1).astype(jnp.float32))
        if idx < 4:
            h = jnp.maximum(h, 0.0).astype(wdt)
    return h


if __name__ == "__main__":
    key = jax.random.PRNGKey(0)
    batch, state_dim, mid_dim, action_dim = 256, 16, 32, 4

    kp, kx = jax.random.split(key)
    state = jax.random.normal(kx, (batch, state_dim), jnp.float32)

    # f32 path (exact module semantics).
    params_f32 = init_qnet_params(kp, state_dim, mid_dim, action_dim, jnp.float32)
    out = jax.block_until_ready(qnet_forward(state, params_f32))
    ref = qnet_reference(state, params_f32)
    assert out.shape == (batch, action_dim)
    assert jnp.allclose(out, ref, atol=1e-5, rtol=1e-5), "f32 mismatch vs reference"

    # Odd batch size exercises the lane-tile padding path.
    state_odd = jax.random.normal(kx, (200, state_dim), jnp.float32)
    out_odd = jax.block_until_ready(qnet_forward(state_odd, params_f32))
    ref_odd = qnet_reference(state_odd, params_f32)
    assert out_odd.shape == (200, action_dim)
    assert jnp.allclose(out_odd, ref_odd, atol=1e-5, rtol=1e-5), "padded-batch mismatch"

    # bf16 weight storage (halves weight HBM traffic on v6e/v7x), f32 accumulation.
    params_bf16 = {k: (v.astype(jnp.bfloat16) if k.startswith("w") else v)
                   for k, v in params_f32.items()}
    out_bf16 = jax.block_until_ready(qnet_forward(state, params_bf16))
    ref_bf16 = qnet_reference(state, params_bf16)
    assert jnp.allclose(out_bf16, ref_bf16, atol=2e-2, rtol=2e-2), "bf16 mismatch"

    print("KERNEL_OK")
</pallas_src>

<mosaic_0001>
module attributes {stable_mosaic.version = 11 : i64} {
  func.func @_qnet_kernel(%arg0: i32, %arg1: memref<128x16xf32, #tpu.memory_space<vmem>>, %arg2: memref<32x16xf32, #tpu.memory_space<vmem>>, %arg3: memref<32x1xf32, #tpu.memory_space<vmem>>, %arg4: memref<32x32xf32, #tpu.memory_space<vmem>>, %arg5: memref<32x1xf32, #tpu.memory_space<vmem>>, %arg6: memref<32x32xf32, #tpu.memory_space<vmem>>, %arg7: memref<32x1xf32, #tpu.memory_space<vmem>>, %arg8: memref<4x32xf32, #tpu.memory_space<vmem>>, %arg9: memref<4x1xf32, #tpu.memory_space<vmem>>, %arg10: memref<4x128xf32, #tpu.memory_space<vmem>>) attributes {dimension_semantics = [#tpu.dimension_semantics<parallel>], iteration_bounds = array<i64: 2>, scalar_prefetch = 0 : i64, scratch_operands = 0 : i64, tpu.core_type = #tpu.core_type<tc>, window_params = [{transform_indices = @transform_0, window_bounds = array<i64: 128, 16>}, {pipeline_mode = #tpu.pipeline_mode<synchronous>, transform_indices = @transform_1, window_bounds = array<i64: 32, 16>}, {pipeline_mode = #tpu.pipeline_mode<synchronous>, transform_indices = @transform_2, window_bounds = array<i64: 32, 1>}, {pipeline_mode = #tpu.pipeline_mode<synchronous>, transform_indices = @transform_3, window_bounds = array<i64: 32, 32>}, {pipeline_mode = #tpu.pipeline_mode<synchronous>, transform_indices = @transform_4, window_bounds = array<i64: 32, 1>}, {pipeline_mode = #tpu.pipeline_mode<synchronous>, transform_indices = @transform_5, window_bounds = array<i64: 32, 32>}, {pipeline_mode = #tpu.pipeline_mode<synchronous>, transform_indices = @transform_6, window_bounds = array<i64: 32, 1>}, {pipeline_mode = #tpu.pipeline_mode<synchronous>, transform_indices = @transform_7, window_bounds = array<i64: 4, 32>}, {pipeline_mode = #tpu.pipeline_mode<synchronous>, transform_indices = @transform_8, window_bounds = array<i64: 4, 1>}, {transform_indices = @transform_9, window_bounds = array<i64: 4, 128>}]} {
    %c0 = arith.constant 0 : index
    %c0_0 = arith.constant 0 : index
    %0 = vector.load %arg1[%c0, %c0_0] : memref<128x16xf32, #tpu.memory_space<vmem>>, vector<128x16xf32>
    %c0_1 = arith.constant 0 : index
    %c0_2 = arith.constant 0 : index
    %1 = vector.load %arg2[%c0_1, %c0_2] : memref<32x16xf32, #tpu.memory_space<vmem>>, vector<32x16xf32>
    %cst = arith.constant dense<0.000000e+00> : vector<32x128xf32>
    %2 = tpu.matmul %1, %0, %cst {dimension_numbers = #tpu.dot_dimension_numbers<[1], [1], [0], [0], [0, 0, 1, 0], [], []>} : vector<32x16xf32>, vector<128x16xf32>, vector<32x128xf32> -> vector<32x128xf32>
    %c0_3 = arith.constant 0 : index
    %c0_4 = arith.constant 0 : index
    %3 = vector.load %arg3[%c0_3, %c0_4] : memref<32x1xf32, #tpu.memory_space<vmem>>, vector<32x1xf32>
    %4 = vector.broadcast %3 : vector<32x1xf32> to vector<32x128xf32>
    %5 = arith.addf %2, %4 : vector<32x128xf32>
    %cst_5 = arith.constant 0.000000e+00 : f32
    %6 = vector.broadcast %cst_5 : f32 to vector<32x128xf32>
    %7 = arith.maximumf %5, %6 : vector<32x128xf32>
    %c0_6 = arith.constant 0 : index
    %c0_7 = arith.constant 0 : index
    %8 = vector.load %arg4[%c0_6, %c0_7] : memref<32x32xf32, #tpu.memory_space<vmem>>, vector<32x32xf32>
    %cst_8 = arith.constant dense<0.000000e+00> : vector<32x128xf32>
    %9 = tpu.matmul %8, %7, %cst_8 {dimension_numbers = #tpu.dot_dimension_numbers<[1], [0], [0], [1], [0, 0, 1, 1], [], []>} : vector<32x32xf32>, vector<32x128xf32>, vector<32x128xf32> -> vector<32x128xf32>
    %c0_9 = arith.constant 0 : index
    %c0_10 = arith.constant 0 : index
    %10 = vector.load %arg5[%c0_9, %c0_10] : memref<32x1xf32, #tpu.memory_space<vmem>>, vector<32x1xf32>
    %11 = vector.broadcast %10 : vector<32x1xf32> to vector<32x128xf32>
    %12 = arith.addf %9, %11 : vector<32x128xf32>
    %cst_11 = arith.constant 0.000000e+00 : f32
    %13 = vector.broadcast %cst_11 : f32 to vector<32x128xf32>
    %14 = arith.maximumf %12, %13 : vector<32x128xf32>
    %c0_12 = arith.constant 0 : index
    %c0_13 = arith.constant 0 : index
    %15 = vector.load %arg6[%c0_12, %c0_13] : memref<32x32xf32, #tpu.memory_space<vmem>>, vector<32x32xf32>
    %cst_14 = arith.constant dense<0.000000e+00> : vector<32x128xf32>
    %16 = tpu.matmul %15, %14, %cst_14 {dimension_numbers = #tpu.dot_dimension_numbers<[1], [0], [0], [1], [0, 0, 1, 1], [], []>} : vector<32x32xf32>, vector<32x128xf32>, vector<32x128xf32> -> vector<32x128xf32>
    %c0_15 = arith.constant 0 : index
    %c0_16 = arith.constant 0 : index
    %17 = vector.load %arg7[%c0_15, %c0_16] : memref<32x1xf32, #tpu.memory_space<vmem>>, vector<32x1xf32>
    %18 = vector.broadcast %17 : vector<32x1xf32> to vector<32x128xf32>
    %19 = arith.addf %16, %18 : vector<32x128xf32>
    %cst_17 = arith.constant 0.000000e+00 : f32
    %20 = vector.broadcast %cst_17 : f32 to vector<32x128xf32>
    %21 = arith.maximumf %19, %20 : vector<32x128xf32>
    %c0_18 = arith.constant 0 : index
    %c0_19 = arith.constant 0 : index
    %22 = vector.load %arg8[%c0_18, %c0_19] : memref<4x32xf32, #tpu.memory_space<vmem>>, vector<4x32xf32>
    %cst_20 = arith.constant dense<0.000000e+00> : vector<4x128xf32>
    %23 = tpu.matmul %22, %21, %cst_20 {dimension_numbers = #tpu.dot_dimension_numbers<[1], [0], [0], [1], [0, 0, 1, 1], [], []>} : vector<4x32xf32>, vector<32x128xf32>, vector<4x128xf32> -> vector<4x128xf32>
    %c0_21 = arith.constant 0 : index
    %c0_22 = arith.constant 0 : index
    %24 = vector.load %arg9[%c0_21, %c0_22] : memref<4x1xf32, #tpu.memory_space<vmem>>, vector<4x1xf32>
    %25 = vector.broadcast %24 : vector<4x1xf32> to vector<4x128xf32>
    %26 = arith.addf %23, %25 : vector<4x128xf32>
    %c0_23 = arith.constant 0 : index
    %c0_24 = arith.constant 0 : index
    %27 = vector.load %arg10[%c0_23, %c0_24] : memref<4x128xf32, #tpu.memory_space<vmem>>, vector<4x128xf32>
    tpu.vector_store %arg10[%c0_23, %c0_24], %26 {strides = array<i32>} : memref<4x128xf32, #tpu.memory_space<vmem>>, vector<4x128xf32>,
    return
  }
  func.func @transform_0(%arg0: i32) -> (i32, i32) {
    %c0_i32 = arith.constant 0 : i32
    %c0_i32_0 = arith.constant 0 : i32
    return %arg0, %c0_i32 : i32, i32
  }
  func.func @transform_1(%arg0: i32) -> (i32, i32) {
    %c0_i32 = arith.constant 0 : i32
    %c0_i32_0 = arith.constant 0 : i32
    %c0_i32_1 = arith.constant 0 : i32
    return %c0_i32, %c0_i32_0 : i32, i32
  }
  func.func @transform_2(%arg0: i32) -> (i32, i32) {
    %c0_i32 = arith.constant 0 : i32
    %c0_i32_0 = arith.constant 0 : i32
    %c0_i32_1 = arith.constant 0 : i32
    return %c0_i32, %c0_i32_0 : i32, i32
  }
  func.func @transform_3(%arg0: i32) -> (i32, i32) {
    %c0_i32 = arith.constant 0 : i32
    %c0_i32_0 = arith.constant 0 : i32
    %c0_i32_1 = arith.constant 0 : i32
    return %c0_i32, %c0_i32_0 : i32, i32
  }
  func.func @transform_4(%arg0: i32) -> (i32, i32) {
    %c0_i32 = arith.constant 0 : i32
    %c0_i32_0 = arith.constant 0 : i32
    %c0_i32_1 = arith.constant 0 : i32
    return %c0_i32, %c0_i32_0 : i32, i32
  }
  func.func @transform_5(%arg0: i32) -> (i32, i32) {
    %c0_i32 = arith.constant 0 : i32
    %c0_i32_0 = arith.constant 0 : i32
    %c0_i32_1 = arith.constant 0 : i32
    return %c0_i32, %c0_i32_0 : i32, i32
  }
  func.func @transform_6(%arg0: i32) -> (i32, i32) {
    %c0_i32 = arith.constant 0 : i32
    %c0_i32_0 = arith.constant 0 : i32
    %c0_i32_1 = arith.constant 0 : i32
    return %c0_i32, %c0_i32_0 : i32, i32
  }
  func.func @transform_7(%arg0: i32) -> (i32, i32) {
    %c0_i32 = arith.constant 0 : i32
    %c0_i32_0 = arith.constant 0 : i32
    %c0_i32_1 = arith.constant 0 : i32
    return %c0_i32, %c0_i32_0 : i32, i32
  }
  func.func @transform_8(%arg0: i32) -> (i32, i32) {
    %c0_i32 = arith.constant 0 : i32
    %c0_i32_0 = arith.constant 0 : i32
    %c0_i32_1 = arith.constant 0 : i32
    return %c0_i32, %c0_i32_0 : i32, i32
  }
  func.func @transform_9(%arg0: i32) -> (i32, i32) {
    %c0_i32 = arith.constant 0 : i32
    %c0_i32_0 = arith.constant 0 : i32
    return %c0_i32, %arg0 : i32, i32
  }
}

</mosaic_0001>

<bundles_post_ra>
// kernel: qnet_forward.1
= control target key start
LH: loop header
LB: loop body
LE: loop exit
PB: predicated region body
PF: predicated region fallthrough
CT: control target
= control target key end

     0   :  { %14 = vsyncpa [#allocation3], 0  ;;  %s1578_s0 = inlined_call_operand.vmem [shape: f32[256,16], index: 0, kind: input, shape index: {}]   ;;  %s1579_s1 = inlined_call_operand.vmem [shape: f32[32,16], index: 1, kind: input, shape index: {}]   ;;  %s1580_s2 = inlined_call_operand.vmem [shape: f32[32,1], index: 2, kind: input, shape index: {}]   ;;  %s1581_s3 = inlined_call_operand.vmem [shape: f32[32,32], index: 3, kind: input, shape index: {}]   ;;  %s1582_s4 = inlined_call_operand.vmem [shape: f32[32,1], index: 4, kind: input, shape index: {}]   ;;  %s1583_s5 = inlined_call_operand.vmem [shape: f32[32,32], index: 5, kind: input, shape index: {}]   ;;  %s1584_s6 = inlined_call_operand.vmem [shape: f32[32,1], index: 6, kind: input, shape index: {}]   ;;  %s1585_s7 = inlined_call_operand.vmem [shape: f32[4,32], index: 7, kind: input, shape index: {}]   ;;  %s1586_s8 = inlined_call_operand.vmem [shape: f32[4,1], index: 8, kind: input, shape index: {}]   ;;  %s1587_s9 = inlined_call_operand.hbm [shape: f32[4,256], index: 9, kind: output, shape index: {}]  }
   0x1   :  { %16 = vsyncpa [#allocation3 + $0x1], 0  ;;  %s1332_s30 = smov 0   ;;  %s1334_s10 = smov 0  }
   0x2   :  { %s1336_s11 = smov 0   ;;  %s1338_s12 = smov 0  }
   0x3 LB: > { %s1353_s13 = sadd.s32 4294967295, %s1275_s12   ;;  %s940_s14 = sadd.s32 4294967294, %s1275_s12   ;;  %s1275_s12 = sphi %s1338_s12, %s1595_s12   ;;  %s1271_s11 = sphi %s1336_s11, %s1594_s11   ;;  %s1267_s10 = sphi %s1334_s10, %s1593_s10   ;;  %s1263_s30 = sphi %s1332_s30, %s1592_s30  }
   0x4   : > { %s1357_s15 = sadd.s32 1, %s1275_s12   ;;  %s223_s16 = sadd.s32 1, %s1271_s11 }
   0x5   : > { %s220_s17 = ssub.s32 %s1275_s12, %s1357_s15  ;;  %p233_p0 = scmp.ne.s32.totalorder %s1271_s11, %s1267_s10 }
   0x6   : > { %p221_p1 = scmp.eq.s32.totalorder %s220_s17, 0  ;;  %p234_p2 = scmp.eq.s32.totalorder %s1353_s13, 1 }
   0x7   : > { %p239_p3 = scmp.ne.s32.totalorder %s1267_s10, %s1263_s30  ;;  %p240_p4 = scmp.eq.s32.totalorder %s940_s14, 1 }
   0x8   : > { %s1368_s18 = scalar_select %p221_p1, %s1271_s11, %s223_s16  }
   0x9   : > { %p1370_p5 = por %p234_p2, %p233_p0  ;;  %p1374_p6 = por %p240_p4, %p239_p3 }
   0xa   : > { %p943_p7 = scmp.ge.s32.totalorder %s1275_s12, 1  ;;  %p291_p8 = scmp.lt.s32.totalorder %s1275_s12, 3 }
   0xc   : > { %p292_p9 = pnand %p943_p7, %p291_p8 }
   0xd   : > { %s945_s21 = sshll.u32 (!%p292_p9), %s1353_s13, 4  ;;  %vm377_vm0 = vcmask (!%p292_p9), 130048   ;;  %v349_v0 = vld [vmem:[%s1579_s1] sm:$0xff] (!%p292_p9)  ;;  %v1277_v1 = vmov (!%p292_p9), 0   ;;  %v355_v3 = vld [vmem:[%s1580_s2 + $0x10] sm:$0xff] (!%p292_p9)  ;;  %v354_v4 = vld [vmem:[%s1580_s2 + $0x8] sm:$0xff] (!%p292_p9) }
   0xe   : > { %295 = sbr.rel (%p292_p9) target bundleno = 999 (0x3e7), region = 56  ;;  %p328_p10 = scmp.lt.s32.totalorder (!%p292_p9), %s945_s21, 31  ;;  %1053 = vmatprep.mubr.msk.f32.mxu0 (!%p292_p9), %vm377_vm0, %v349_v0  ;;  %1211 = vset.pattern.permute.xlu0 (!%p292_p9), %v1277_v1  ;;  %v353_v2 = vld [vmem:[%s1580_s2] sm:$0xff] (!%p292_p9)  ;;  %v356_v5 = vld [vmem:[%s1580_s2 + $0x18] sm:$0xff] (!%p292_p9)  ;;  %vm1404_vm1 = vmpackc.low (!%p292_p9), %vm377_vm0, %vm377_vm0  ;;  %vm555_vm2 = vcmask (!%p292_p9), 261120   ;;  %vm1279_vm3 = vmmov (!%p292_p9), 0  }
   0xf   : > { %359 = vperm.xlu0 (!%p292_p9), %1211, %v353_v2   ;;  %1212 = vset.pattern.permute.xlu1 (!%p292_p9), %v1277_v1  ;;  %v531_v7 = vld [vmem:[%s1582_s4] sm:$0xff] (!%p292_p9)  ;;  %v532_v13 = vld [vmem:[%s1582_s4 + $0x8] sm:$0xff] (!%p292_p9)  ;;  %v533_v15 = vld [vmem:[%s1582_s4 + $0x10] sm:$0xff] (!%p292_p9)  ;;  %s324_s16 = sand.u32 (!%p292_p9), 1, %s1267_s10   ;;  %s977_s22 = sshll.u32 (!%p292_p9), %s1353_s13, 6 }
  0x10   : > { %369 = vperm.xlu1 (!%p292_p9), %1212, %v355_v3   ;;  %v534_v16 = vld [vmem:[%s1582_s4 + $0x18] sm:$0xff] (!%p292_p9)  ;;  %v661_v19 = vld [vmem:[%s1584_s6] sm:$0xff] (!%p292_p9)  ;;  %v662_v21 = vld [vmem:[%s1584_s6 + $0x8] sm:$0xff] (!%p292_p9)  ;;  %s868_s27 = scalar_lea.sflag (!%p292_p9), [#allocation3], %s324_s16  ;;  %s1281_s13 = smov (!%p292_p9), [#allocation2]  }
  0x11   : > { %v663_v22 = vld [vmem:[%s1584_s6 + $0x10] sm:$0xff] (!%p292_p9)  ;;  %v664_v23 = vld [vmem:[%s1584_s6 + $0x18] sm:$0xff] (!%p292_p9)  ;;  %v787_v26 = vld [vmem:[%s1586_s8] sm:$0xf] (!%p292_p9)  ;;  %s1217_s29 = sshll.u32 (!%p292_p9), %s1281_s13, 4  ;;  %s1218_s29 = int_to_ptr.vmem [resolvable:$false] %s1217_s29 }
  0x12   : > { %v350_v40 = vld [vmem:[%s1579_s1 + $0x8] sm:$0xff] (!%p292_p9)  ;;  %v351_v41 = vld [vmem:[%s1579_s1 + $0x10] sm:$0xff] (!%p292_p9)  ;;  %v352_v42 = vld [vmem:[%s1579_s1 + $0x18] sm:$0xff] (!%p292_p9)  ;;  %s1219_s14 = scalar_lea.vmem (!%p292_p9), %s1218_s29, 128 }
  0x13   : > { %364 = vperm.xlu0 (!%p292_p9), %1211, %v354_v4   ;;  %v527_v43 = vld [vmem:[%s1581_s3] sm:$0xff] (!%p292_p9)  ;;  %v528_v62 = vld [vmem:[%s1581_s3 + $0x8] sm:$0xff] (!%p292_p9)  ;;  %v529_v63 = vld [vmem:[%s1581_s3 + $0x10] sm:$0xff] (!%p292_p9) }
  0x14   : > { %374 = vperm.xlu1 (!%p292_p9), %1212, %v356_v5   ;;  %1067 = vmatprep.mubr.msk.f32.mxu1 (!%p292_p9), %vm555_vm2, %v527_v43  ;;  %v530_v0 = vld [vmem:[%s1581_s3 + $0x18] sm:$0xff] (!%p292_p9)  ;;  %v657_v1 = vld [vmem:[%s1583_s5] sm:$0xff] (!%p292_p9) }
  0x15   : > { %s1597_s21 = smov (!%p328_p10, %s945_s21), 31  ;;  %v786_v43 = vld [vmem:[%s1585_s7] sm:$0xf] }
  0x16   : > { %s946_s17 = sshll.u32 %s1597_s21, 3  ;;  %s1536_s21 = scalar_lea.hbm %s1587_s9, %s977_s22 }
  0x17   : > { %s1400_s24 = scalar_lea.vmem %s1578_s0, %s946_s17  ;;  %537 = vperm.xlu0 %1211, %v531_v7   ;;  %s944_s17 = sshll.u32 %s324_s16, 2 }
  0x18   : > { %v333_v8 = vld [vmem:[%s1400_s24] sm:$0xff]  ;;  %v334_v9 = vld [vmem:[%s1400_s24 + $0x8] sm:$0xff]  ;;  %v335_v10 = vld [vmem:[%s1400_s24 + $0x10] sm:$0xff]  ;;  %542 = vperm.xlu1 %1212, %v532_v13   ;;  %s326_s23 = scalar_lea.vmem [#allocation2], %s944_s17 }
  0x19   : > { %v1098_v11 = vpack.c.bf16 %v334_v9, %v333_v8  ;;  %v336_v12 = vld [vmem:[%s1400_s24 + $0x18] sm:$0xff]  ;;  %v337_v17 = vld [vmem:[%s1400_s24 + $0x20] sm:$0xff]  ;;  %v338_v18 = vld [vmem:[%s1400_s24 + $0x28] sm:$0xff] }
  0x1a   : > { %v1104_v14 = vpack.c.bf16 %v336_v12, %v335_v10  ;;  %v1110_v20 = vpack.c.bf16 %v338_v18, %v337_v17  ;;  %v339_v24 = vld [vmem:[%s1400_s24 + $0x30] sm:$0xff]  ;;  %v340_v25 = vld [vmem:[%s1400_s24 + $0x38] sm:$0xff]  ;;  %v341_v28 = vld [vmem:[%s1400_s24 + $0x40] sm:$0xff] }
  0x1b   : > { %1100 = vmatprep.subr.msk.bf16.mxu0 %vm1404_vm1, %v1098_v11  ;;  %547 = vperm.xlu0 %1211, %v533_v15   ;;  %v1116_v27 = vpack.c.bf16 %v340_v25, %v339_v24  ;;  %v342_v29 = vld [vmem:[%s1400_s24 + $0x48] sm:$0xff]  ;;  %v343_v31 = vld [vmem:[%s1400_s24 + $0x50] sm:$0xff]  ;;  %v344_v32 = vld [vmem:[%s1400_s24 + $0x58] sm:$0xff]  ;;  %v1280_v24 = vmov 0.0  }
  0x1c   : > { %1103 = vmatpush3.bf16.xpose.msk.msra.mxu0 %vm1404_vm1, %v1098_v11  ;;  %552 = vperm.xlu1 %1212, %v534_v16   ;;  %v1122_v30 = vpack.c.bf16 %v342_v29, %v341_v28  ;;  %v1128_v33 = vpack.c.bf16 %v344_v32, %v343_v31  ;;  %v345_v34 = vld [vmem:[%s1400_s24 + $0x60] sm:$0xff]  ;;  %v346_v35 = vld [vmem:[%s1400_s24 + $0x68] sm:$0xff]  ;;  %v347_v37 = vld [vmem:[%s1400_s24 + $0x70] sm:$0xff] }
  0x1d   : > { %1106 = vmatprep.subr.msk.bf16.mxu0 %vm1404_vm1, %v1104_v14  ;;  %v1134_v36 = vpack.c.bf16 %v346_v35, %v345_v34  ;;  %v348_v38 = vld [vmem:[%s1400_s24 + $0x78] sm:$0xff]  ;;  %s881_s24 = sshll.u32 %s326_s23, 4  ;;  %s1538_s24 = int_to_ptr.vmem [resolvable:$true] %s881_s24 }
  0x1e   : > { %v1140_v39 = vpack.c.bf16 %v348_v38, %v347_v37  ;;  %s1213_s28 = scalar_lea.vmem %s1538_s24, 64  ;;  %p1220_p0 = scmp.lt.s32.totalorder %s1538_s24, %s1218_s29 }
  0x1f   : > { %667 = vperm.xlu0 %1211, %v661_v19   ;;  %p1214_p11 = scmp.ne.s32.totalorder %s1538_s24, %s1213_s28  ;;  %p1221_p1 = scmp.lt.s32.totalorder %s1219_s14, %s1213_s28 }
  0x20   : > { %672 = vperm.xlu1 %1212, %v662_v21   ;;  %v659_v21 = vld [vmem:[%s1583_s5 + $0x10] sm:$0xff] }
  0x21   : > { %p1215_p12 = pnand %p1214_p11, %p1370_p5  ;;  %p1222_p2 = por %p1221_p1, %p1220_p0 }
  0x23   : > { %677 = vperm.xlu0 %1211, %v663_v22   ;;  %v660_v22 = vld [vmem:[%s1583_s5 + $0x18] sm:$0xff]  ;;  %p1216_p13 = pneg %p1215_p12 }
  0x24   : > { %1109 = vmatpush3.bf16.xpose.msk.msra.mxu0 %vm1404_vm1, %v1104_v14  ;;  %682 = vperm.xlu1 %1212, %v664_v23   ;;  %v1278_v23 = vmov 0.0|0.0  }
  0x25   : > { %1112 = vmatprep.subr.msk.bf16.mxu0 %vm1404_vm1, %v1110_v20  ;;  %p1223_p3 = pnand %p1222_p2, %p1216_p13 }
  0x27   : > { %790 = vperm.xlu0 %1211, %v787_v26  }
  0x2c   : > { %1115 = vmatpush3.bf16.xpose.msk.msra.mxu0 %vm1404_vm1, %v1110_v20  ;;  %v658_v20 = vld [vmem:[%s1583_s5 + $0x8] sm:$0xff] }
  0x2d   : > { %1118 = vmatprep.subr.msk.bf16.mxu0 %vm1404_vm1, %v1116_v27 }
  0x34   : > { %1121 = vmatpush3.bf16.xpose.msk.msra.mxu0 %vm1404_vm1, %v1116_v27 }
  0x35   : > { %1124 = vmatprep.subr.msk.bf16.mxu0 %vm1404_vm1, %v1122_v30 }
  0x3c   : > { %1127 = vmatpush3.bf16.xpose.msk.msra.mxu0 %vm1404_vm1, %v1122_v30 }
  0x3d   : > { %1130 = vmatprep.subr.msk.bf16.mxu0 %vm1404_vm1, %v1128_v33 }
  0x44   : > { %1133 = vmatpush3.bf16.xpose.msk.msra.mxu0 %vm1404_vm1, %v1128_v33 }
  0x45   : > { %1136 = vmatprep.subr.msk.bf16.mxu0 %vm1404_vm1, %v1134_v36 }
  0x4c   : > { %1139 = vmatpush3.bf16.xpose.msk.msra.mxu0 %vm1404_vm1, %v1134_v36 }
  0x4d   : > { %1142 = vmatprep.subr.msk.bf16.mxu0 %vm1404_vm1, %v1140_v39 }
  0x54   : > { %1145 = vmatpush3.bf16.xpose.msk.msra.mxu0 %vm1404_vm1, %v1140_v39 }
  0x5b   : > { %1054 = vmatmul.mubr.msk.f32.vlgmr.msra.gmra.mrb[0].mxu0 %vm377_vm0, %v350_v40 }
  0x5c   : > { %1056 = vmatprep.mubr.msk.f32.mxu0 %vm377_vm0, %v351_v41 }
  0x5f   : > { %1057 = vmatmul.mubr.msk.f32.gmra.mrb[2].mxu0 %vm377_vm0, %v352_v42 }
  0x8e   : > { %v360_v44 = vpop.permute.xlu0 %359 }
  0x8f   : > { %v370_v45 = vpop.permute.xlu1 %369 }
  0x92   : > { %v365_v46 = vpop.permute.xlu0 %364 }
  0x93   : > { %v375_v52 = vpop.permute.xlu1 %374 }
  0x96   : > { %v538_v3 = vpop.permute.xlu0 %537 }
  0x97   : > { %v543_v2 = vpop.permute.xlu1 %542 }
  0x9a   : > { %v548_v12 = vpop.permute.xlu0 %547 }
  0x9b   : > { %v553_v9 = vpop.permute.xlu1 %552 }
  0x9e   : > { %v668_v26 = vpop.permute.xlu0 %667 }
  0x9f   : > { %v673_v25 = vpop.permute.xlu1 %672 }
  0xa2   : > { %v678_v35 = vpop.permute.xlu0 %677 }
  0xa3   : > { %v683_v32 = vpop.permute.xlu1 %682 }
 0x12e   : > { %v1055_v47 = vpop.f32.mrb[0].mxu0 }
 0x12f   : > { %v510_v48 = vadd.f32 %v1055_v47, %v365_v46  ;;  %v504_v49 = vpop.f32.mrb[1].mxu0 }
 0x130   : > { %v505_v50 = vadd.f32 %v504_v49, %v360_v44  ;;  %v791_v44 = vpop.permute.xlu0 %790 }
 0x131   : > { %v524_v51 = vmax.f32 %v510_v48, 0.0 }
 0x132   : > { %v523_v53 = vmax.f32 %v505_v50, 0.0  ;;  %v1058_v54 = vpop.f32.mrb[2].mxu0 }
 0x133   : > { %v520_v55 = vadd.f32 %v1058_v54, %v375_v52  ;;  %v514_v56 = vpop.f32.mrb[3].mxu0 }
 0x134   : > { %v515_v57 = vadd.f32 %v514_v56, %v370_v45  ;;  %v1146_v58 = vpack.c.bf16 %v524_v51, %v523_v53 }
 0x135   : > { %v526_v59 = vmax.f32 %v520_v55, 0.0 }
 0x136   : > { %v525_v60 = vmax.f32 %v515_v57, 0.0  ;;  %1147 = vmatprep.subr.bf16.mxu1 %v1146_v58 }
 0x137   : > { %1149 = vmatpush3.bf16.msra.mxu1 %v1146_v58 }
 0x138   : > { %v1150_v61 = vpack.c.bf16 %v526_v59, %v525_v60 }
 0x13a   : > { %1151 = vmatprep.subr.bf16.mxu1 %v1150_v61 }
 0x13b   : > { %1153 = vmatpush3.bf16.msra.mxu1 %v1150_v61 }
 0x13e   : > { %1068 = vmatmul.mubr.msk.f32.vlgmr.msra.gmra.mrb[0].mxu1 %vm555_vm2, %v528_v62 }
 0x13f   : > { %1070 = vmatprep.mubr.msk.f32.mxu1 %vm555_vm2, %v529_v63 }
 0x142   : > { %1071 = vmatmul.mubr.msk.f32.gmra.mrb[2].mxu1 %vm555_vm2, %v530_v0 }
 0x143   : > { %1081 = vmatprep.mubr.msk.f32.mxu1 %vm555_vm2, %v657_v1 }
 0x211   : > { %v1069_v4 = vpop.f32.mrb[0].mxu1 }
 0x212   : > { %v640_v5 = vadd.f32 %v1069_v4, %v543_v2  ;;  %v634_v6 = vpop.f32.mrb[1].mxu1 }
 0x213   : > { %v635_v7 = vadd.f32 %v634_v6, %v538_v3 }
 0x214   : > { %v654_v8 = vmax.f32 %v640_v5, 0.0 }
 0x215   : > { %v653_v10 = vmax.f32 %v635_v7, 0.0  ;;  %v1072_v11 = vpop.f32.mrb[2].mxu1 }
 0x216   : > { %v650_v13 = vadd.f32 %v1072_v11, %v553_v9  ;;  %v644_v14 = vpop.f32.mrb[3].mxu1 }
 0x217   : > { %v1154_v15 = vpack.c.bf16 %v654_v8, %v653_v10  ;;  %v645_v16 = vadd.f32 %v644_v14, %v548_v12 }
 0x218   : > { %v656_v17 = vmax.f32 %v650_v13, 0.0 }
 0x219   : > { %v655_v18 = vmax.f32 %v645_v16, 0.0  ;;  %1155 = vmatprep.subr.bf16.mxu1 %v1154_v15 }
 0x21a   : > { %1157 = vmatpush3.bf16.msra.mxu1 %v1154_v15 }
 0x21b   : > { %v1158_v19 = vpack.c.bf16 %v656_v17, %v655_v18 }
 0x21d   : > { %1159 = vmatprep.subr.bf16.mxu1 %v1158_v19 }
 0x21e   : > { %1161 = vmatpush3.bf16.msra.mxu1 %v1158_v19 }
 0x21f   : > { %1162 = vmatprep.subr.bf16.mxu1 %v1278_v23 }
 0x221   : > { %1082 = vmatmul.mubr.msk.f32.vlgmr.msra.gmra.mrb[4].mxu1 %vm555_vm2, %v658_v20 }
 0x222   : > { %1084 = vmatprep.mubr.msk.f32.mxu1 %vm555_vm2, %v659_v21 }
 0x225   : > { %1085 = vmatmul.mubr.msk.f32.gmra.mrb[6].mxu1 %vm555_vm2, %v660_v22 }
 0x226   : > { %1095 = vmatprep.mubr.msk.f32.mxu1 %vm1279_vm3, %v1280_v24 }
 0x2f4   : > { %v1083_v27 = vpop.f32.mrb[4].mxu1 }
 0x2f5   : > { %v769_v28 = vadd.f32 %v1083_v27, %v673_v25  ;;  %v763_v29 = vpop.f32.mrb[5].mxu1 }
 0x2f6   : > { %v764_v30 = vadd.f32 %v763_v29, %v668_v26 }
 0x2f7   : > { %v783_v31 = vmax.f32 %v769_v28, 0.0 }
 0x2f8   : > { %v782_v33 = vmax.f32 %v764_v30, 0.0  ;;  %v1086_v34 = vpop.f32.mrb[6].mxu1 }
 0x2f9   : > { %v779_v36 = vadd.f32 %v1086_v34, %v683_v32  ;;  %v773_v37 = vpop.f32.mrb[7].mxu1 }
 0x2fa   : > { %v1163_v38 = vpack.c.bf16 %v783_v31, %v782_v33  ;;  %v774_v39 = vadd.f32 %v773_v37, %v678_v35 }
 0x2fb   : > { %v785_v40 = vmax.f32 %v779_v36, 0.0 }
 0x2fc   : > { %v784_v41 = vmax.f32 %v774_v39, 0.0  ;;  %1164 = vmatpush3.bf16.msra.mxu1 %v1163_v38 }
 0x2fd   : > { %1165 = vmatprep.subr.bf16.mxu1 %v1278_v23 }
 0x2fe   : > { %v1166_v42 = vpack.c.bf16 %v785_v40, %v784_v41 }
 0x300   : > { %1167 = vmatpush3.bf16.msra.mxu1 %v1166_v42 }
 0x303   : > { %1096 = vmatmul.mubr.msk.f32.vlgmr.msra.gmra.mrb[8].mxu1 %vm555_vm2, %v786_v43 }
 0x3d6   : > { %v862_v45 = vpop.f32.mrb[8].mxu1 }
 0x3d7   : > { %v863_v46 = vadd.f32 %v862_v45, %v791_v44  ;;  %v1097_v47 = vpop.f32.mrb[9].mxu1 }
 0x3d9   : > { %866 = vst [vmem:[%s326_s23] sm:$0xf] %v863_v46 }
 0x3da   : > { %1226 = shalt.err (!%p1223_p3)
}
 0x3db   : > { %s1227_s16 = scalar_lea.hbm %s1536_s21, 64  ;;  %s1231_s23 = scalar_lea.hbm %s1587_s9, 128 }
 0x3dc   : > { %p1228_p4 = scmp.ne.s32.totalorder %s1536_s21, %s1227_s16  ;;  %p1232_p9 = scmp.lt.u32.totalorder %s1536_s21, %s1587_s9 }
 0x3dd   : > { %p1233_p10 = scmp.lt.u32.totalorder %s1231_s23, %s1227_s16  ;;  %p1235_p12 = scmp.lt.u32.totalorder %s1227_s16, %s1536_s21 }
 0x3de   : > { %p1229_p7 = pnand %p1228_p4, %p1370_p5 }
 0x3df   : > { %p1234_p11 = por %p1233_p10, %p1232_p9 }
 0x3e0   : > { %p1230_p8 = pneg %p1229_p7 }
 0x3e1   : > { %p1236_p13 = por %p1235_p12, %p1234_p11 }
 0x3e3   : > { %p1237_p0 = pnand %p1236_p13, %p1230_p8 }
 0x3e5   : > { %1240 = shalt.err (!%p1237_p0)
}
 0x3e6   : > { %1168 = dma.vmem_to_hbm [thread:$0]  (%p1370_p5), %s1538_s24, 64, %s1536_s21, %s868_s27  }
 0x3e7 PF: > { %p1174_p1 = scmp.ge.s32.totalorder %s1275_s12, 2  ;;  %s893_s28 = sand.u32 1, %s1263_s30  }
 0x3e8   : > { %s894_s13 = scalar_lea.sflag [#allocation3], %s893_s28 }
 0x3e9   : > { %p1171_p2 = pnand %p1174_p1, %p1374_p6 }
 0x3eb   : > { %1258 = dma.done.wait (!%p1171_p2), %s894_s13, 64  }
 0x3ec   : > { %1260 = vsyncadd (!%p1171_p2), %s894_s13, 4294967232  ;;  %p19_p3 = scmp.ge.s32.totalorder %s1357_s15, 4   ;;  %s1592_s30 = smov %s1267_s10 }
 0x3ed   : > { %s1593_s10 = smov %s1271_s11  ;;  %s1594_s11 = smov %s1368_s18 }
 0x3ee   : > { %s1595_s12 = smov %s1357_s15  ;;  %21 = sbr.rel (!%p19_p3) target bundleno = 3 (0x3), region = 91 }
 0x3f5   :  { %899 = vsyncpa [#allocation3], 1 }
 0x3f6   :  { %901 = vsyncpa [#allocation3 + $0x1], 1 }

</bundles_post_ra>
